<compile_context>
chip_gen: v7x
topology: tpu7x:2x2x1
jax: 0.10.0
libtpu: 0.0.40
codegen_flags: <defaults>
</compile_context>

<pallas_src>
import functools

import jax
import jax.numpy as jnp
from jax.experimental import pallas as pl
from jax.experimental.pallas import tpu as pltpu

_LANE = 128
_SUBLANE = 8


def _round_up(v, m):
    return ((v + m - 1) // m) * m


def _mix32(x):
    """lowbias32: good 32-bit integer mixer.  VALU-only (no EUP/transcendentals)."""
    x = x ^ (x >> jnp.uint32(16))
    x = x * jnp.uint32(0x7FEB352D)
    x = x ^ (x >> jnp.uint32(15))
    x = x * jnp.uint32(0x846CA68B)
    x = x ^ (x >> jnp.uint32(16))
    return x


def _baseline_kernel(seed_ref,
                     x_ref, w1_ref, b1_ref, w2_ref, b2_ref, w3t_ref, b3t_ref,
                     out_ref,
                     *, read_noise_std, quant_step, neg_slope):
    x = x_ref[...].astype(jnp.float32)
    tb, d = x.shape

    # ---- in-kernel counter-based PRNG (portable, VALU-only) -----------------
    # Counter = global flattened element index, so the noise stream is
    # independent of the batch-tile choice (tiling-reproducible).
    row0 = pl.program_id(0) * tb
    rows = jax.lax.broadcasted_iota(jnp.int32, (tb, d), 0) + row0
    cols = jax.lax.broadcasted_iota(jnp.int32, (tb, d), 1)
    cnt = (rows * jnp.int32(d) + cols).astype(jnp.uint32)

    s = seed_ref[0].astype(jnp.uint32)
    k0 = _mix32(s + jnp.uint32(0x9E3779B9))   # per-stream keys (hashed, not adjacent)
    k1 = _mix32(s + jnp.uint32(0x3C6EF372))
    k2 = _mix32(s + jnp.uint32(0xDAA66D2B))

    h0 = _mix32(cnt ^ k0)
    h1 = _mix32(cnt ^ k1)
    hq = _mix32(cnt ^ k2)

    lo16 = jnp.uint32(0xFFFF)
    u0 = (h0 & lo16).astype(jnp.int32).astype(jnp.float32)
    u1 = (h0 >> jnp.uint32(16)).astype(jnp.int32).astype(jnp.float32)
    u2 = (h1 & lo16).astype(jnp.int32).astype(jnp.float32)
    u3 = (h1 >> jnp.uint32(16)).astype(jnp.int32).astype(jnp.float32)
    # Irwin-Hall / CLT Gaussian approximation from four 16-bit uniforms
    # (mean 2*65535, var ~ 65536^2/3) -> ~N(0, 1).
    gauss = (u0 + u1 + u2 + u3 - 2.0 * 65535.0) * (3.0 ** 0.5 / 65536.0)
    # 23-bit uniform in [0, 1) for the quantization noise.
    uq = (hq >> jnp.uint32(9)).astype(jnp.int32).astype(jnp.float32) * (2.0 ** -23)

    # ---- sensor model (VPU) --------------------------------------------------
    x = x + gauss * read_noise_std          # x + randn_like(x) * read_noise_std
    x = x + uq * quant_step                 # x + rand_like(x) * 2**-n_bits
    x = jnp.maximum(x, 0.0)                 # clamp(x, 0, inf)

    # ---- TaskNetwork: Linear -> LeakyReLU -> Linear -> LeakyReLU -> Linear ---
    h = jnp.dot(x, w1_ref[...], preferred_element_type=jnp.float32) + b1_ref[...]
    h = jnp.where(h > 0, h, neg_slope * h)

    h = jnp.dot(h, w2_ref[...], preferred_element_type=jnp.float32) + b2_ref[...]
    h = jnp.where(h > 0, h, neg_slope * h)

    # Transposed last layer: (OP8, H2p) @ (tb, H2p)^T -> (OP8, tb), stored with
    # the batch on the lane axis (lane-dense output slab, ~16x fewer out bytes).
    out_t = jax.lax.dot_general(
        w3t_ref[...], h, (((1,), (1,)), ((), ())),
        preferred_element_type=jnp.float32)
    out_ref[...] = (out_t + b3t_ref[...]).astype(out_ref.dtype)


def _vmem_limit_bytes():
    """Generation-aware scoped-VMEM request (conservative fallback off-TPU)."""
    try:
        cap = pltpu.get_tpu_info().vmem_capacity_bytes
    except Exception:
        cap = 64 * 1024 * 1024        # assume the smallest target (v7x) if unknown
    return int(min(cap // 2, 64 * 1024 * 1024))   # v5e/v6e: 64 MiB, v7x: 32 MiB


def _pick_batch_tile(B, bytes_per_row, budget, requested):
    if requested is not None:
        tb = B if requested >= B else requested
        assert tb == B or tb % _LANE == 0, \
            "batch_tile must be >= batch size or a multiple of 128"
        return tb
    cap = max(_SUBLANE, budget // max(bytes_per_row, 1))
    cap = min(cap, 1024)
    if B <= cap:
        # Whole batch fits in one tile.  If it splits cleanly into two
        # 128-multiples, use two tiles so both v7x TensorCores get work.
        if B >= 2 * _LANE and (B // 2) % _LANE == 0:
            return B // 2
        return B
    return max(_LANE, (cap // _LANE) * _LANE)


def baseline_forward(x_img, params, *, seed=0,
                     read_noise_std=1.0 / 255.0, sensor_n_bits=8,
                     neg_slope=0.1, batch_tile=None):
    """x_img: (B, H, W) (or any (B, ...)).  Returns (B, output_size) float32."""
    B = x_img.shape[0]
    x = x_img.reshape(B, -1)          # keep native dtype; upcast happens in-kernel
    D = x.shape[1]

    w1, b1, w2, b2, w3, b3 = params
    H1, H2, O = w1.shape[1], w2.shape[1], w3.shape[1]

    # Pad hidden widths to full 128-lane vregs; pad the (transposed) output rows
    # to a sublane multiple.  Zero padding is exact (padded units stay 0).
    H1p = _round_up(H1, _LANE)
    H2p = _round_up(H2, _LANE)
    OP8 = _round_up(O, _SUBLANE)

    f32 = jnp.float32
    w1p = jnp.zeros((D, H1p), f32).at[:, :H1].set(w1.astype(f32))
    b1p = jnp.zeros((1, H1p), f32).at[:, :H1].set(b1.reshape(1, H1).astype(f32))
    w2p = jnp.zeros((H1p, H2p), f32).at[:H1, :H2].set(w2.astype(f32))
    b2p = jnp.zeros((1, H2p), f32).at[:, :H2].set(b2.reshape(1, H2).astype(f32))
    w3t = jnp.zeros((OP8, H2p), f32).at[:O, :H2].set(w3.astype(f32).T)
    b3t = jnp.zeros((OP8, 1), f32).at[:O, 0].set(b3.reshape(-1).astype(f32))

    vmem_limit = _vmem_limit_bytes()
    itemsize = jnp.dtype(x.dtype).itemsize
    # Resident weights (double-buffered by the pipeline) come out of the budget.
    # TODO(synk): single-buffer the constant weight blocks (pl.Buffered(1)) once
    # that pipeline_mode is verified on all targets; footprint is tiny here.
    weight_bytes = 8 * (D * H1p + H1p + H1p * H2p + H2p + OP8 * H2p + OP8)
    bytes_per_row = (2 * D * itemsize                  # double-buffered x tile
                     + 4 * (3 * D                      # f32 copy + noise temporaries
                            + H1p + H2p                # hidden activations
                            + 2 * OP8))                # double-buffered out tile
    budget = max(0, int(0.6 * vmem_limit) - weight_bytes)

    tb = _pick_batch_tile(B, bytes_per_row, budget, batch_tile)
    Bp = _round_up(B, tb)
    if Bp != B:
        x = jnp.zeros((Bp, D), x.dtype).at[:B].set(x)   # padded rows sliced off below
    grid = (Bp // tb,)

    quant_step = 1.0 / float(2 ** sensor_n_bits)
    kernel = functools.partial(
        _baseline_kernel,
        read_noise_std=float(read_noise_std),
        quant_step=quant_step,
        neg_slope=float(neg_slope),
    )

    flops = 2 * Bp * (D * H1p + H1p * H2p + H2p * OP8)
    bytes_accessed = (Bp * D * itemsize + 4 * OP8 * Bp
                      + 4 * (D * H1p + H1p + H1p * H2p + H2p + OP8 * H2p + OP8))
    cost = pl.CostEstimate(flops=flops, transcendentals=0,
                           bytes_accessed=bytes_accessed)

    seed_arr = jnp.asarray([seed], dtype=jnp.int32)

    # index_maps receive (grid_i, *scalar_prefetch_refs)
    batch_in_spec = pl.BlockSpec((tb, D), lambda i, s: (i, 0))
    full = lambda shp: pl.BlockSpec(shp, lambda i, s, n=len(shp): (0,) * n)

    out_t = pl.pallas_call(
        kernel,
        out_shape=jax.ShapeDtypeStruct((OP8, Bp), jnp.float32),
        grid_spec=pltpu.PrefetchScalarGridSpec(
            num_scalar_prefetch=1,
            grid=grid,
            in_specs=[
                batch_in_spec,                     # x (only streamed input)
                full((D, H1p)), full((1, H1p)),    # linear1 (lane-padded)
                full((H1p, H2p)), full((1, H2p)),  # linear2 (lane-padded)
                full((OP8, H2p)), full((OP8, 1)),  # linear3 (transposed, row-padded)
            ],
            out_specs=pl.BlockSpec((OP8, tb), lambda i, s: (0, i)),
        ),
        compiler_params=pltpu.CompilerParams(
            dimension_semantics=("parallel",),
            vmem_limit_bytes=vmem_limit,
        ),
        cost_estimate=cost,
    )(seed_arr, x, w1p, b1p, w2p, b2p, w3t, b3t)

    # Tiny (O, B) slice + transpose back to the PyTorch layout.
    return out_t[:O, :B].T


def init_params(key, num_inputs, num_outputs, hidden_layer_size):
    """Deterministic init of the TaskNetwork (hidden_layer_count = 2)."""
    def linear_init(k, fan_in, fan_out):
        kw, kb = jax.random.split(k)
        bound = 1.0 / jnp.sqrt(fan_in)
        w = jax.random.uniform(kw, (fan_in, fan_out), jnp.float32, -bound, bound)
        b = jax.random.uniform(kb, (1, fan_out), jnp.float32, -bound, bound)
        return w, b

    k1, k2, k3 = jax.random.split(key, 3)
    w1, b1 = linear_init(k1, num_inputs, hidden_layer_size)
    w2, b2 = linear_init(k2, hidden_layer_size, hidden_layer_size)
    w3, b3 = linear_init(k3, hidden_layer_size, num_outputs)
    return (w1, b1, w2, b2, w3, b3)


if __name__ == "__main__":
    # Small shapes consistent with the module:
    # img_size = (16, 16) -> task_network_input = 256, output_size = 4,
    # hidden_layer_size = 32, hidden_layer_count = 2, batch = 16.
    B, H, W = 16, 16, 16
    hidden = 32
    output_size = 4

    key = jax.random.PRNGKey(0)
    k_x, k_p = jax.random.split(key)

    x_img = jax.random.uniform(k_x, (B, H, W), jnp.float32)   # downsampled image
    params = init_params(k_p, H * W, output_size, hidden)

    out = baseline_forward(x_img, params, seed=42)
    out = jax.block_until_ready(out)

    assert out.shape == (B, output_size)
    assert out.dtype == jnp.float32
    assert bool(jnp.all(jnp.isfinite(out)))

    # Sanity check: the sensor noise is tiny (<= ~0.008 per pixel), so the kernel
    # output should closely track a noise-free pure-JAX reference of the same MLP.
    def ref_forward(x_img, params, neg_slope=0.1):
        x = jnp.maximum(x_img.reshape(x_img.shape[0], -1), 0.0)
        w1, b1, w2, b2, w3, b3 = params
        h = x @ w1 + b1
        h = jnp.where(h > 0, h, neg_slope * h)
        h = h @ w2 + b2
        h = jnp.where(h > 0, h, neg_slope * h)
        return h @ w3 + b3

    ref = ref_forward(x_img, params)
    assert float(jnp.max(jnp.abs(out - ref))) < 0.5

    print("KERNEL_OK")
</pallas_src>

<mosaic_0001>
module attributes {stable_mosaic.version = 11 : i64} {
  func.func @_baseline_kernel(%arg0: i32, %arg1: memref<1xi32, #tpu.memory_space<smem>>, %arg2: memref<16x256xf32, #tpu.memory_space<vmem>>, %arg3: memref<256x128xf32, #tpu.memory_space<vmem>>, %arg4: memref<1x128xf32, #tpu.memory_space<vmem>>, %arg5: memref<128x128xf32, #tpu.memory_space<vmem>>, %arg6: memref<1x128xf32, #tpu.memory_space<vmem>>, %arg7: memref<8x128xf32, #tpu.memory_space<vmem>>, %arg8: memref<8x1xf32, #tpu.memory_space<vmem>>, %arg9: memref<8x16xf32, #tpu.memory_space<vmem>>) attributes {dimension_semantics = [#tpu.dimension_semantics<parallel>], iteration_bounds = array<i64: 1>, scalar_prefetch = 1 : i64, scratch_operands = 0 : i64, tpu.core_type = #tpu.core_type<tc>, window_params = [{transform_indices = @transform_0, window_bounds = array<i64: 16, 256>}, {pipeline_mode = #tpu.pipeline_mode<synchronous>, transform_indices = @transform_1, window_bounds = array<i64: 256, 128>}, {pipeline_mode = #tpu.pipeline_mode<synchronous>, transform_indices = @transform_2, window_bounds = array<i64: 1, 128>}, {pipeline_mode = #tpu.pipeline_mode<synchronous>, transform_indices = @transform_3, window_bounds = array<i64: 128, 128>}, {pipeline_mode = #tpu.pipeline_mode<synchronous>, transform_indices = @transform_4, window_bounds = array<i64: 1, 128>}, {pipeline_mode = #tpu.pipeline_mode<synchronous>, transform_indices = @transform_5, window_bounds = array<i64: 8, 128>}, {pipeline_mode = #tpu.pipeline_mode<synchronous>, transform_indices = @transform_6, window_bounds = array<i64: 8, 1>}, {transform_indices = @transform_7, window_bounds = array<i64: 8, 16>}]} {
    %c0 = arith.constant 0 : index
    %c0_0 = arith.constant 0 : index
    %0 = vector.load %arg2[%c0, %c0_0] : memref<16x256xf32, #tpu.memory_space<vmem>>, vector<16x256xf32>
    %c16_i32 = arith.constant 16 : i32
    %1 = arith.muli %arg0, %c16_i32 : i32
    %2 = tpu.iota {dimensions = array<i32: 0>} : vector<16x256xi32>
    %3 = vector.broadcast %1 : i32 to vector<16x256xi32>
    %4 = arith.addi %2, %3 : vector<16x256xi32>
    %5 = tpu.iota {dimensions = array<i32: 1>} : vector<16x256xi32>
    %c256_i32 = arith.constant 256 : i32
    %6 = vector.broadcast %c256_i32 : i32 to vector<16x256xi32>
    %7 = arith.muli %4, %6 : vector<16x256xi32>
    %8 = arith.addi %7, %5 : vector<16x256xi32>
    %c0_1 = arith.constant 0 : index
    %9 = memref.load %arg1[%c0_1] : memref<1xi32, #tpu.memory_space<smem>>
    %c-1640531527_i32 = arith.constant -1640531527 : i32
    %10 = arith.addi %9, %c-1640531527_i32 : i32
    %c16_i32_2 = arith.constant 16 : i32
    %11 = arith.shrui %10, %c16_i32_2 : i32
    %12 = arith.xori %10, %11 : i32
    %c2146121005_i32 = arith.constant 2146121005 : i32
    %13 = arith.muli %12, %c2146121005_i32 : i32
    %c15_i32 = arith.constant 15 : i32
    %14 = arith.shrui %13, %c15_i32 : i32
    %15 = arith.xori %13, %14 : i32
    %c-2073254261_i32 = arith.constant -2073254261 : i32
    %16 = arith.muli %15, %c-2073254261_i32 : i32
    %c16_i32_3 = arith.constant 16 : i32
    %17 = arith.shrui %16, %c16_i32_3 : i32
    %18 = arith.xori %16, %17 : i32
    %c1013904242_i32 = arith.constant 1013904242 : i32
    %19 = arith.addi %9, %c1013904242_i32 : i32
    %c16_i32_4 = arith.constant 16 : i32
    %20 = arith.shrui %19, %c16_i32_4 : i32
    %21 = arith.xori %19, %20 : i32
    %c2146121005_i32_5 = arith.constant 2146121005 : i32
    %22 = arith.muli %21, %c2146121005_i32_5 : i32
    %c15_i32_6 = arith.constant 15 : i32
    %23 = arith.shrui %22, %c15_i32_6 : i32
    %24 = arith.xori %22, %23 : i32
    %c-2073254261_i32_7 = arith.constant -2073254261 : i32
    %25 = arith.muli %24, %c-2073254261_i32_7 : i32
    %c16_i32_8 = arith.constant 16 : i32
    %26 = arith.shrui %25, %c16_i32_8 : i32
    %27 = arith.xori %25, %26 : i32
    %c-626627285_i32 = arith.constant -626627285 : i32
    %28 = arith.addi %9, %c-626627285_i32 : i32
    %c16_i32_9 = arith.constant 16 : i32
    %29 = arith.shrui %28, %c16_i32_9 : i32
    %30 = arith.xori %28, %29 : i32
    %c2146121005_i32_10 = arith.constant 2146121005 : i32
    %31 = arith.muli %30, %c2146121005_i32_10 : i32
    %c15_i32_11 = arith.constant 15 : i32
    %32 = arith.shrui %31, %c15_i32_11 : i32
    %33 = arith.xori %31, %32 : i32
    %c-2073254261_i32_12 = arith.constant -2073254261 : i32
    %34 = arith.muli %33, %c-2073254261_i32_12 : i32
    %c16_i32_13 = arith.constant 16 : i32
    %35 = arith.shrui %34, %c16_i32_13 : i32
    %36 = arith.xori %34, %35 : i32
    %37 = vector.broadcast %18 : i32 to vector<16x256xi32>
    %38 = arith.xori %8, %37 : vector<16x256xi32>
    %c16_i32_14 = arith.constant 16 : i32
    %39 = vector.broadcast %c16_i32_14 : i32 to vector<16x256xi32>
    %40 = arith.shrui %38, %39 : vector<16x256xi32>
    %41 = arith.xori %38, %40 : vector<16x256xi32>
    %c2146121005_i32_15 = arith.constant 2146121005 : i32
    %42 = vector.broadcast %c2146121005_i32_15 : i32 to vector<16x256xi32>
    %43 = arith.muli %41, %42 : vector<16x256xi32>
    %c15_i32_16 = arith.constant 15 : i32
    %44 = vector.broadcast %c15_i32_16 : i32 to vector<16x256xi32>
    %45 = arith.shrui %43, %44 : vector<16x256xi32>
    %46 = arith.xori %43, %45 : vector<16x256xi32>
    %c-2073254261_i32_17 = arith.constant -2073254261 : i32
    %47 = vector.broadcast %c-2073254261_i32_17 : i32 to vector<16x256xi32>
    %48 = arith.muli %46, %47 : vector<16x256xi32>
    %c16_i32_18 = arith.constant 16 : i32
    %49 = vector.broadcast %c16_i32_18 : i32 to vector<16x256xi32>
    %50 = arith.shrui %48, %49 : vector<16x256xi32>
    %51 = arith.xori %48, %50 : vector<16x256xi32>
    %52 = vector.broadcast %27 : i32 to vector<16x256xi32>
    %53 = arith.xori %8, %52 : vector<16x256xi32>
    %c16_i32_19 = arith.constant 16 : i32
    %54 = vector.broadcast %c16_i32_19 : i32 to vector<16x256xi32>
    %55 = arith.shrui %53, %54 : vector<16x256xi32>
    %56 = arith.xori %53, %55 : vector<16x256xi32>
    %c2146121005_i32_20 = arith.constant 2146121005 : i32
    %57 = vector.broadcast %c2146121005_i32_20 : i32 to vector<16x256xi32>
    %58 = arith.muli %56, %57 : vector<16x256xi32>
    %c15_i32_21 = arith.constant 15 : i32
    %59 = vector.broadcast %c15_i32_21 : i32 to vector<16x256xi32>
    %60 = arith.shrui %58, %59 : vector<16x256xi32>
    %61 = arith.xori %58, %60 : vector<16x256xi32>
    %c-2073254261_i32_22 = arith.constant -2073254261 : i32
    %62 = vector.broadcast %c-2073254261_i32_22 : i32 to vector<16x256xi32>
    %63 = arith.muli %61, %62 : vector<16x256xi32>
    %c16_i32_23 = arith.constant 16 : i32
    %64 = vector.broadcast %c16_i32_23 : i32 to vector<16x256xi32>
    %65 = arith.shrui %63, %64 : vector<16x256xi32>
    %66 = arith.xori %63, %65 : vector<16x256xi32>
    %67 = vector.broadcast %36 : i32 to vector<16x256xi32>
    %68 = arith.xori %8, %67 : vector<16x256xi32>
    %c16_i32_24 = arith.constant 16 : i32
    %69 = vector.broadcast %c16_i32_24 : i32 to vector<16x256xi32>
    %70 = arith.shrui %68, %69 : vector<16x256xi32>
    %71 = arith.xori %68, %70 : vector<16x256xi32>
    %c2146121005_i32_25 = arith.constant 2146121005 : i32
    %72 = vector.broadcast %c2146121005_i32_25 : i32 to vector<16x256xi32>
    %73 = arith.muli %71, %72 : vector<16x256xi32>
    %c15_i32_26 = arith.constant 15 : i32
    %74 = vector.broadcast %c15_i32_26 : i32 to vector<16x256xi32>
    %75 = arith.shrui %73, %74 : vector<16x256xi32>
    %76 = arith.xori %73, %75 : vector<16x256xi32>
    %c-2073254261_i32_27 = arith.constant -2073254261 : i32
    %77 = vector.broadcast %c-2073254261_i32_27 : i32 to vector<16x256xi32>
    %78 = arith.muli %76, %77 : vector<16x256xi32>
    %c16_i32_28 = arith.constant 16 : i32
    %79 = vector.broadcast %c16_i32_28 : i32 to vector<16x256xi32>
    %80 = arith.shrui %78, %79 : vector<16x256xi32>
    %81 = arith.xori %78, %80 : vector<16x256xi32>
    %c65535_i32 = arith.constant 65535 : i32
    %82 = vector.broadcast %c65535_i32 : i32 to vector<16x256xi32>
    %83 = arith.andi %51, %82 : vector<16x256xi32>
    %84 = arith.sitofp %83 : vector<16x256xi32> to vector<16x256xf32>
    %c16_i32_29 = arith.constant 16 : i32
    %85 = vector.broadcast %c16_i32_29 : i32 to vector<16x256xi32>
    %86 = arith.shrui %51, %85 : vector<16x256xi32>
    %87 = arith.sitofp %86 : vector<16x256xi32> to vector<16x256xf32>
    %c65535_i32_30 = arith.constant 65535 : i32
    %88 = vector.broadcast %c65535_i32_30 : i32 to vector<16x256xi32>
    %89 = arith.andi %66, %88 : vector<16x256xi32>
    %90 = arith.sitofp %89 : vector<16x256xi32> to vector<16x256xf32>
    %c16_i32_31 = arith.constant 16 : i32
    %91 = vector.broadcast %c16_i32_31 : i32 to vector<16x256xi32>
    %92 = arith.shrui %66, %91 : vector<16x256xi32>
    %93 = arith.sitofp %92 : vector<16x256xi32> to vector<16x256xf32>
    %94 = arith.addf %84, %87 : vector<16x256xf32>
    %95 = arith.addf %94, %90 : vector<16x256xf32>
    %96 = arith.addf %95, %93 : vector<16x256xf32>
    %cst = arith.constant 1.310700e+05 : f32
    %97 = vector.broadcast %cst : f32 to vector<16x256xf32>
    %98 = arith.subf %96, %97 : vector<16x256xf32>
    %cst_32 = arith.constant 2.64289974E-5 : f32
    %99 = vector.broadcast %cst_32 : f32 to vector<16x256xf32>
    %100 = arith.mulf %98, %99 : vector<16x256xf32>
    %c9_i32 = arith.constant 9 : i32
    %101 = vector.broadcast %c9_i32 : i32 to vector<16x256xi32>
    %102 = arith.shrui %81, %101 : vector<16x256xi32>
    %103 = arith.sitofp %102 : vector<16x256xi32> to vector<16x256xf32>
    %cst_33 = arith.constant 1.1920929E-7 : f32
    %104 = vector.broadcast %cst_33 : f32 to vector<16x256xf32>
    %105 = arith.mulf %103, %104 : vector<16x256xf32>
    %cst_34 = arith.constant 0.00392156886 : f32
    %106 = vector.broadcast %cst_34 : f32 to vector<16x256xf32>
    %107 = arith.mulf %100, %106 : vector<16x256xf32>
    %108 = arith.addf %0, %107 : vector<16x256xf32>
    %cst_35 = arith.constant 3.906250e-03 : f32
    %109 = vector.broadcast %cst_35 : f32 to vector<16x256xf32>
    %110 = arith.mulf %105, %109 : vector<16x256xf32>
    %111 = arith.addf %108, %110 : vector<16x256xf32>
    %cst_36 = arith.constant 0.000000e+00 : f32
    %112 = vector.broadcast %cst_36 : f32 to vector<16x256xf32>
    %113 = arith.maximumf %111, %112 : vector<16x256xf32>
    %c0_37 = arith.constant 0 : index
    %c0_38 = arith.constant 0 : index
    %114 = vector.load %arg3[%c0_37, %c0_38] : memref<256x128xf32, #tpu.memory_space<vmem>>, vector<256x128xf32>
    %cst_39 = arith.constant dense<0.000000e+00> : vector<16x128xf32>
    %115 = tpu.matmul %113, %114, %cst_39 {dimension_numbers = #tpu.dot_dimension_numbers<[1], [0], [0], [1], [0, 0, 1, 1], [], []>} : vector<16x256xf32>, vector<256x128xf32>, vector<16x128xf32> -> vector<16x128xf32>
    %c0_40 = arith.constant 0 : index
    %c0_41 = arith.constant 0 : index
    %116 = vector.load %arg4[%c0_40, %c0_41] : memref<1x128xf32, #tpu.memory_space<vmem>>, vector<1x128xf32>
    %117 = vector.broadcast %116 : vector<1x128xf32> to vector<16x128xf32>
    %118 = arith.addf %115, %117 : vector<16x128xf32>
    %cst_42 = arith.constant 0.000000e+00 : f32
    %119 = vector.broadcast %cst_42 : f32 to vector<16x128xf32>
    %120 = arith.cmpf ogt, %118, %119 : vector<16x128xf32>
    %cst_43 = arith.constant 1.000000e-01 : f32
    %121 = vector.broadcast %cst_43 : f32 to vector<16x128xf32>
    %122 = arith.mulf %121, %118 : vector<16x128xf32>
    %123 = arith.select %120, %118, %122 : vector<16x128xi1>, vector<16x128xf32>
    %c0_44 = arith.constant 0 : index
    %c0_45 = arith.constant 0 : index
    %124 = vector.load %arg5[%c0_44, %c0_45] : memref<128x128xf32, #tpu.memory_space<vmem>>, vector<128x128xf32>
    %cst_46 = arith.constant dense<0.000000e+00> : vector<16x128xf32>
    %125 = tpu.matmul %123, %124, %cst_46 {dimension_numbers = #tpu.dot_dimension_numbers<[1], [0], [0], [1], [0, 0, 1, 1], [], []>} : vector<16x128xf32>, vector<128x128xf32>, vector<16x128xf32> -> vector<16x128xf32>
    %c0_47 = arith.constant 0 : index
    %c0_48 = arith.constant 0 : index
    %126 = vector.load %arg6[%c0_47, %c0_48] : memref<1x128xf32, #tpu.memory_space<vmem>>, vector<1x128xf32>
    %127 = vector.broadcast %126 : vector<1x128xf32> to vector<16x128xf32>
    %128 = arith.addf %125, %127 : vector<16x128xf32>
    %cst_49 = arith.constant 0.000000e+00 : f32
    %129 = vector.broadcast %cst_49 : f32 to vector<16x128xf32>
    %130 = arith.cmpf ogt, %128, %129 : vector<16x128xf32>
    %cst_50 = arith.constant 1.000000e-01 : f32
    %131 = vector.broadcast %cst_50 : f32 to vector<16x128xf32>
    %132 = arith.mulf %131, %128 : vector<16x128xf32>
    %133 = arith.select %130, %128, %132 : vector<16x128xi1>, vector<16x128xf32>
    %c0_51 = arith.constant 0 : index
    %c0_52 = arith.constant 0 : index
    %134 = vector.load %arg7[%c0_51, %c0_52] : memref<8x128xf32, #tpu.memory_space<vmem>>, vector<8x128xf32>
    %cst_53 = arith.constant dense<0.000000e+00> : vector<8x16xf32>
    %135 = tpu.matmul %134, %133, %cst_53 {dimension_numbers = #tpu.dot_dimension_numbers<[1], [1], [0], [0], [0, 0, 1, 0], [], []>} : vector<8x128xf32>, vector<16x128xf32>, vector<8x16xf32> -> vector<8x16xf32>
    %c0_54 = arith.constant 0 : index
    %c0_55 = arith.constant 0 : index
    %136 = vector.load %arg8[%c0_54, %c0_55] : memref<8x1xf32, #tpu.memory_space<vmem>>, vector<8x1xf32>
    %137 = vector.broadcast %136 : vector<8x1xf32> to vector<8x16xf32>
    %138 = arith.addf %135, %137 : vector<8x16xf32>
    %c0_56 = arith.constant 0 : index
    %c0_57 = arith.constant 0 : index
    %139 = vector.load %arg9[%c0_56, %c0_57] : memref<8x16xf32, #tpu.memory_space<vmem>>, vector<8x16xf32>
    tpu.vector_store %arg9[%c0_56, %c0_57], %138 {strides = array<i32>} : memref<8x16xf32, #tpu.memory_space<vmem>>, vector<8x16xf32>,
    return
  }
  func.func @transform_0(%arg0: i32, %arg1: memref<1xi32, #tpu.memory_space<smem>>) -> (i32, i32) {
    %c0_i32 = arith.constant 0 : i32
    %c0_i32_0 = arith.constant 0 : i32
    return %arg0, %c0_i32 : i32, i32
  }
  func.func @transform_1(%arg0: i32, %arg1: memref<1xi32, #tpu.memory_space<smem>>) -> (i32, i32) {
    %c0_i32 = arith.constant 0 : i32
    %c0_i32_0 = arith.constant 0 : i32
    %c0_i32_1 = arith.constant 0 : i32
    return %c0_i32, %c0_i32_0 : i32, i32
  }
  func.func @transform_2(%arg0: i32, %arg1: memref<1xi32, #tpu.memory_space<smem>>) -> (i32, i32) {
    %c0_i32 = arith.constant 0 : i32
    %c0_i32_0 = arith.constant 0 : i32
    %c0_i32_1 = arith.constant 0 : i32
    return %c0_i32, %c0_i32_0 : i32, i32
  }
  func.func @transform_3(%arg0: i32, %arg1: memref<1xi32, #tpu.memory_space<smem>>) -> (i32, i32) {
    %c0_i32 = arith.constant 0 : i32
    %c0_i32_0 = arith.constant 0 : i32
    %c0_i32_1 = arith.constant 0 : i32
    return %c0_i32, %c0_i32_0 : i32, i32
  }
  func.func @transform_4(%arg0: i32, %arg1: memref<1xi32, #tpu.memory_space<smem>>) -> (i32, i32) {
    %c0_i32 = arith.constant 0 : i32
    %c0_i32_0 = arith.constant 0 : i32
    %c0_i32_1 = arith.constant 0 : i32
    return %c0_i32, %c0_i32_0 : i32, i32
  }
  func.func @transform_5(%arg0: i32, %arg1: memref<1xi32, #tpu.memory_space<smem>>) -> (i32, i32) {
    %c0_i32 = arith.constant 0 : i32
    %c0_i32_0 = arith.constant 0 : i32
    %c0_i32_1 = arith.constant 0 : i32
    return %c0_i32, %c0_i32_0 : i32, i32
  }
  func.func @transform_6(%arg0: i32, %arg1: memref<1xi32, #tpu.memory_space<smem>>) -> (i32, i32) {
    %c0_i32 = arith.constant 0 : i32
    %c0_i32_0 = arith.constant 0 : i32
    %c0_i32_1 = arith.constant 0 : i32
    return %c0_i32, %c0_i32_0 : i32, i32
  }
  func.func @transform_7(%arg0: i32, %arg1: memref<1xi32, #tpu.memory_space<smem>>) -> (i32, i32) {
    %c0_i32 = arith.constant 0 : i32
    %c0_i32_0 = arith.constant 0 : i32
    return %c0_i32, %arg0 : i32, i32
  }
}

</mosaic_0001>

<bundles_post_ra>
// kernel: tpu_custom_call.1
= control target key start
LH: loop header
LB: loop body
LE: loop exit
PB: predicated region body
PF: predicated region fallthrough
CT: control target
= control target key end

     0   :  { %14 = vsyncpa [#allocation5], 0  ;;  %s1183_s0 = inlined_call_operand.<no memory space> [shape: s32[1], index: 0, kind: input, shape index: {}]   ;;  %s1184_s1 = inlined_call_operand.hbm [shape: f32[16,256], index: 1, kind: input, shape index: {}]   ;;  %s1185_s2 = inlined_call_operand.hbm [shape: f32[256,128], index: 2, kind: input, shape index: {}]   ;;  %s1186_s3 = inlined_call_operand.vmem [shape: f32[1,128], index: 3, kind: input, shape index: {}]   ;;  %s1187_s4 = inlined_call_operand.hbm [shape: f32[128,128], index: 4, kind: input, shape index: {}]   ;;  %s1188_s5 = inlined_call_operand.vmem [shape: f32[1,128], index: 5, kind: input, shape index: {}]   ;;  %s1189_s6 = inlined_call_operand.vmem [shape: f32[8,128], index: 6, kind: input, shape index: {}]   ;;  %s1190_s7 = inlined_call_operand.vmem [shape: f32[8,1], index: 7, kind: input, shape index: {}]   ;;  %s1191_s8 = inlined_call_operand.hbm [shape: f32[8,16], index: 8, kind: output, shape index: {}]  }
   0x1   :  { %15 = vsyncpa [#allocation8], 0 }
   0x2   :  { %16 = vsyncpa [#allocation6], 0  ;;  %s913_s27 = smov [#allocation7]   ;;  %s819_s9 = scalar_lea.hbm %s1185_s2, 4096 }
   0x3   :  { %s34_s28 = sshll.u32 %s913_s27, 4  ;;  %p820_p0 = scmp.ne.s32.totalorder %s1185_s2, %s819_s9  ;;  %s35_s28 = int_to_ptr.vmem [resolvable:$true] %s34_s28 }
   0x4   :  { %p823_p1 = scmp.lt.u32.totalorder %s819_s9, %s1185_s2 }
   0x6   :  { %p825_p2 = pnand %p823_p1, %p820_p0 }
   0x8   :  { %828 = shalt.err (!%p825_p2)
}
   0x9   :  { %s829_s14 = scalar_lea.vmem %s35_s28, 4096  ;;  %p834_p4 = scmp.lt.s32.totalorder %s35_s28, %s35_s28 }
   0xa   :  { %p830_p3 = scmp.ne.s32.totalorder %s35_s28, %s829_s14  ;;  %p835_p5 = scmp.lt.s32.totalorder %s829_s14, %s829_s14 }
   0xc   :  { %p836_p6 = por %p835_p5, %p834_p4 }
   0xe   :  { %p837_p7 = pnand %p836_p6, %p830_p3 }
  0x10   :  { %840 = shalt.err (!%p837_p7)
}
  0x11   :  { %s914_s15 = smov 128   ;;  %s915_s16 = smov 8  }
  0x12   :  { %40 = dma.hbm_to_vmem [thread:$0]  %s1185_s2, 4096, %s35_s28, [#allocation8], %s914_s15, %s914_s15, %s915_s16  }
  0x13   :  { %s916_s19 = smov [#allocation4]   ;;  %s841_s23 = scalar_lea.hbm %s1184_s1, 512 }
  0x14   :  { %s22_s20 = sshll.u32 %s916_s19, 4  ;;  %p842_p8 = scmp.ne.s32.totalorder %s1184_s1, %s841_s23  ;;  %s23_s20 = int_to_ptr.vmem [resolvable:$true] %s22_s20 }
  0x15   :  { %p845_p9 = scmp.lt.u32.totalorder %s841_s23, %s1184_s1 }
  0x17   :  { %p847_p10 = pnand %p845_p9, %p842_p8 }
  0x19   :  { %850 = shalt.err (!%p847_p10)
}
  0x1a   :  { %s851_s29 = scalar_lea.vmem %s23_s20, 512  ;;  %p856_p12 = scmp.lt.s32.totalorder %s23_s20, %s23_s20 }
  0x1b   :  { %p852_p11 = scmp.ne.s32.totalorder %s23_s20, %s851_s29  ;;  %p857_p13 = scmp.lt.s32.totalorder %s851_s29, %s851_s29 }
  0x1d   :  { %p858_p0 = por %p857_p13, %p856_p12 }
  0x1f   :  { %p859_p1 = pnand %p858_p0, %p852_p11 }
  0x21   :  { %862 = shalt.err (!%p859_p1)
}
  0x22   :  { %s917_s2 = smov 256   ;;  %s918_s28 = smov 16  }
  0x23   :  { %28 = dma.hbm_to_vmem [thread:$0]  %s1184_s1, 512, %s23_s20, [#allocation5], %s917_s2, %s917_s2, %s918_s28  }
  0x24   :  { %s919_s10 = smov [#allocation9]   ;;  %s863_s14 = scalar_lea.hbm %s1187_s4, 2048 }
  0x25   :  { %s48_s11 = sshll.u32 %s919_s10, 4  ;;  %p864_p2 = scmp.ne.s32.totalorder %s1187_s4, %s863_s14  ;;  %s49_s11 = int_to_ptr.vmem [resolvable:$true] %s48_s11 }
  0x26   :  { %p867_p3 = scmp.lt.u32.totalorder %s863_s14, %s1187_s4 }
  0x28   :  { %p869_p4 = pnand %p867_p3, %p864_p2 }
  0x2a   :  { %872 = shalt.err (!%p869_p4)
}
  0x2b   :  { %s873_s22 = scalar_lea.vmem %s49_s11, 2048  ;;  %p878_p6 = scmp.lt.s32.totalorder %s49_s11, %s49_s11 }
  0x2c   :  { %p874_p5 = scmp.ne.s32.totalorder %s49_s11, %s873_s22  ;;  %p879_p7 = scmp.lt.s32.totalorder %s873_s22, %s873_s22 }
  0x2e   :  { %p880_p8 = por %p879_p7, %p878_p6 }
  0x30   :  { %p881_p9 = pnand %p880_p8, %p874_p5 }
  0x32   :  { %884 = shalt.err (!%p881_p9)
}
  0x33   :  { %54 = dma.hbm_to_vmem [thread:$0]  %s1187_s4, 2048, %s49_s11, [#allocation8], %s914_s15, %s914_s15, %s915_s16  }
  0x34   :  { %907 = dma.done.wait [#allocation5], 512  }
  0x35   :  { %908 = vsyncadd [#allocation5], 4294966784 }
  0x36   :  { %909 = dma.done.wait [#allocation8], 6144  }
  0x37   :  { %910 = vsyncadd [#allocation8], 4294961152  ;;  %v75_v0 = vlaneseq  ;;  %s91_s25 = sadd.s32 2654435769, %s1183_s0  ;;  %s100_s29 = sadd.s32 1013904242, %s1183_s0 }
  0x38   :  { %s92_s2 = sshrl.u32 %s91_s25, 16  ;;  %s101_s28 = sshrl.u32 %s100_s29, 16  ;;  %v329_v7 = vld [vmem:[#allocation7 + $0x80] sm:$0xff]  ;;  %v330_v8 = vld [vmem:[#allocation7 + $0x88] sm:$0xff]  ;;  %v331_v12 = vld [vmem:[#allocation7 + $0x90] sm:$0xff]  ;;  %vm921_vm2 = vmmov 0  }
  0x39   :  { %v76_v1 = vshrl.u32 %v75_v0, 7  ;;  %v82_v2 = vand.u32 127, %v75_v0  ;;  %s93_s30 = sxor.u32 %s92_s2, %s91_s25  ;;  %s102_s9 = sxor.u32 %s101_s28, %s100_s29  ;;  %v313_v9 = vld [vmem:[#allocation7] sm:$0xff]  ;;  %v739_v10 = vpack.c.bf16 %v330_v8, %v329_v7  ;;  %v314_v11 = vld [vmem:[#allocation7 + $0x8] sm:$0xff]  ;;  %v332_v13 = vld [vmem:[#allocation7 + $0x98] sm:$0xff]  ;;  %vm614_vm5 = vcmask 130048  }
  0x3a   :  { %s94_s4 = smul.u32 2146121005, %s93_s30  ;;  %s109_s10 = sadd.s32 3668340011, %s1183_s0  ;;  %v741_v16 = vpack.c.bf16 %v314_v11, %v313_v9  ;;  %v743_v17 = vpack.c.bf16 %v332_v13, %v331_v12  ;;  %v315_v18 = vld [vmem:[#allocation7 + $0x10] sm:$0xff]  ;;  %v316_v19 = vld [vmem:[#allocation7 + $0x18] sm:$0xff] }
  0x3b   :  { %v77_v3 = vadd.s32 8, %v76_v1  ;;  %v83_v4 = vadd.s32 128, %v82_v2  ;;  %v84_v5 = vmul.u32 256, %v76_v1  ;;  %s103_s11 = smul.u32 2146121005, %s102_s9  ;;  %s110_s12 = sshrl.u32 %s109_s10, 16  ;;  %740 = vmatprep.subr.bf16.mxu0 %v739_v10  ;;  %v745_v26 = vpack.c.bf16 %v316_v19, %v315_v18 }
  0x3c   :  { %s95_s13 = sshrl.u32 %s94_s4, 15  ;;  %s1021_s14 = sxor.u32 %s110_s12, %s109_s10  ;;  %v333_v20 = vld [vmem:[#allocation7 + $0xa0] sm:$0xff]  ;;  %v334_v21 = vld [vmem:[#allocation7 + $0xa8] sm:$0xff]  ;;  %742 = vmatpush3.bf16.msra.mxu0 %v741_v16  ;;  %v1041_v29 = vld [vmem:[#allocation7 + $0xb0] sm:$0xff] }
  0x3d   :  { %s96_s17 = sxor.u32 %s95_s13, %s94_s4  ;;  %s104_s18 = sshrl.u32 %s103_s11, 15  ;;  %v85_v6 = vmul.u32 256, %v77_v3  ;;  %v1025_v14 = vadd.s32 %v84_v5, %v83_v4  ;;  %v1028_v15 = vadd.s32 %v84_v5, %v82_v2  ;;  %v1031_v22 = vld [vmem:[#allocation7 + $0x20] sm:$0xff]  ;;  %v1033_v23 = vld [vmem:[#allocation7 + $0x28] sm:$0xff]  ;;  %v747_v27 = vpack.c.bf16 %v334_v21, %v333_v20  ;;  %v336_v30 = vld [vmem:[#allocation7 + $0xb8] sm:$0xff]  ;;  %744 = vmatprep.subr.bf16.mxu0 %v743_v17 }
  0x3e   :  { %s97_s19 = smul.u32 2221713035, %s96_s17  ;;  %s1023_s21 = sxor.u32 %s104_s18, %s103_s11  ;;  %v749_v28 = vpack.c.bf16 %v1033_v23, %v1031_v22  ;;  %v1043_v31 = vld [vmem:[#allocation7 + $0x30] sm:$0xff]  ;;  %v751_v33 = vpack.c.bf16 %v336_v30, %v1041_v29  ;;  %v1048_v34 = vld [vmem:[#allocation7 + $0x38] sm:$0xff]  ;;  %v1050_v35 = vld [vmem:[#allocation7 + $0xc0] sm:$0xff] }
  0x3f   :  { %s106_s0 = smul.u32 2221713035, %s1023_s21  ;;  %v1035_v24 = vadd.s32 %v85_v6, %v83_v4  ;;  %v1037_v25 = vadd.s32 %v85_v6, %v82_v2  ;;  %v1052_v36 = vld [vmem:[#allocation7 + $0xc8] sm:$0xff]  ;;  %v753_v40 = vpack.c.bf16 %v1048_v34, %v1043_v31  ;;  %v1066_v42 = vld [vmem:[#allocation7 + $0x40] sm:$0xff]  ;;  %v1070_v44 = vld [vmem:[#allocation7 + $0xd0] sm:$0xff]  ;;  %s924_s10 = smov [#allocation10]  }
  0x40   :  { %s98_s22 = sshrl.u32 %s97_s19, 16  ;;  %s112_s1 = smul.u32 2146121005, %s1021_s14  ;;  %v755_v41 = vpack.c.bf16 %v1052_v36, %v1050_v35  ;;  %v1068_v43 = vld [vmem:[#allocation7 + $0x48] sm:$0xff]  ;;  %v1079_v48 = vld [vmem:[#allocation7 + $0xd8] sm:$0xff]  ;;  %v1081_v49 = vld [vmem:[#allocation7 + $0x50] sm:$0xff]  ;;  %746 = vmatpush3.bf16.msra.mxu0 %v745_v26 }
  0x41   :  { %s99_s20 = sxor.u32 %s98_s22, %s97_s19  ;;  %s107_s23 = sshrl.u32 %s106_s0, 16  ;;  %v757_v47 = vpack.c.bf16 %v1068_v43, %v1066_v42  ;;  %v1083_v50 = vld [vmem:[#allocation7 + $0x58] sm:$0xff]  ;;  %v759_v54 = vpack.c.bf16 %v1079_v48, %v1070_v44  ;;  %v1091_v56 = vld [vmem:[#allocation7 + $0xe0] sm:$0xff]  ;;  %v1093_v57 = vld [vmem:[#allocation7 + $0xe8] sm:$0xff]  ;;  %748 = vmatprep.subr.bf16.mxu0 %v747_v27 }
  0x42   :  { %s108_s24 = sxor.u32 %s107_s23, %s106_s0  ;;  %s113_s25 = sshrl.u32 %s112_s1, 15  ;;  %v1045_v32 = vstv %s99_s20  ;;  %v761_v55 = vpack.c.bf16 %v1083_v50, %v1081_v49  ;;  %v1095_v58 = vld [vmem:[#allocation7 + $0x60] sm:$0xff]  ;;  %v763_v61 = vpack.c.bf16 %v1093_v57, %v1091_v56  ;;  %v1099_v62 = vld [vmem:[#allocation7 + $0x68] sm:$0xff]  ;;  %v1101_v63 = vld [vmem:[#allocation7 + $0xf0] sm:$0xff] }
  0x43   :  { %s1054_s26 = sxor.u32 %s113_s25, %s112_s1  ;;  %v120_v37 = vxor.u32 %v1045_v32, %v1025_v14  ;;  %v1058_v38 = vstv %s108_s24  ;;  %v119_v39 = vxor.u32 %v1045_v32, %v1028_v15  ;;  %v122_v53 = vxor.u32 %v1045_v32, %v1035_v24  ;;  %v1103_v0 = vld [vmem:[#allocation7 + $0xf8] sm:$0xff]  ;;  %v1109_v6 = vld [vmem:[#allocation7 + $0x70] sm:$0xff] }
  0x44   :  { %s115_s27 = smul.u32 2221713035, %s1054_s26  ;;  %v157_v45 = vxor.u32 %v1058_v38, %v1025_v14  ;;  %v156_v46 = vxor.u32 %v1058_v38, %v1028_v15  ;;  %v765_v4 = vpack.c.bf16 %v1099_v62, %v1095_v58  ;;  %v767_v5 = vpack.c.bf16 %v1103_v0, %v1101_v63  ;;  %v1111_v7 = vld [vmem:[#allocation7 + $0x78] sm:$0xff]  ;;  %750 = vmatpush3.bf16.msra.mxu0 %v749_v28 }
  0x45   :  { %v124_v51 = vshrl.u32 %v120_v37, 16  ;;  %v123_v52 = vshrl.u32 %v119_v39, 16  ;;  %v126_v3 = vshrl.u32 %v122_v53, 16  ;;  %v769_v10 = vpack.c.bf16 %v1111_v7, %v1109_v6  ;;  %752 = vmatprep.subr.bf16.mxu0 %v751_v33  ;;  %v71_v7 = vld [vmem:[#allocation4 + $0x8] sm:$0xff] }
  0x46   :  { %s116_s29 = sshrl.u32 %s115_s27, 16  ;;  %v161_v59 = vshrl.u32 %v157_v45, 16  ;;  %v160_v60 = vshrl.u32 %v156_v46, 16  ;;  %v159_v23 = vxor.u32 %v1058_v38, %v1035_v24  ;;  %v121_v6 = vxor.u32 %v1045_v32, %v1037_v25 }
  0x47   :  { %s117_s2 = sxor.u32 %s116_s29, %s115_s27  ;;  %v128_v1 = vxor.u32 %v124_v51, %v120_v37  ;;  %v127_v2 = vxor.u32 %v123_v52, %v119_v39  ;;  %v130_v19 = vxor.u32 %v126_v3, %v122_v53  ;;  %v158_v32 = vxor.u32 %v1058_v38, %v1037_v25 }
  0x48   :  { %v165_v8 = vxor.u32 %v161_v59, %v157_v45  ;;  %v1113_v9 = vstv %s117_s2  ;;  %v164_v17 = vxor.u32 %v160_v60, %v156_v46  ;;  %v163_v34 = vshrl.u32 %v159_v23, 16  ;;  %754 = vmatpush3.bf16.msra.mxu0 %v753_v40 }
  0x49   :  { %v132_v11 = vmul.u32 2146121005, %v128_v1  ;;  %v194_v12 = vxor.u32 %v1113_v9, %v1025_v14  ;;  %v131_v13 = vmul.u32 2146121005, %v127_v2  ;;  %v193_v18 = vxor.u32 %v1113_v9, %v1028_v15  ;;  %756 = vmatprep.subr.bf16.mxu0 %v755_v41 }
  0x4a   :  { %v169_v16 = vmul.u32 2146121005, %v165_v8  ;;  %v168_v27 = vmul.u32 2146121005, %v164_v17  ;;  %v167_v51 = vxor.u32 %v163_v34, %v159_v23  ;;  %v1128_v52 = vxor.u32 %v1113_v9, %v1035_v24 }
  0x4b   :  { %v136_v20 = vshrl.u32 %v132_v11, 15  ;;  %v198_v21 = vshrl.u32 %v194_v12, 16  ;;  %v135_v22 = vshrl.u32 %v131_v13, 15  ;;  %v197_v29 = vshrl.u32 %v193_v18, 16 }
  0x4c   :  { %v173_v26 = vshrl.u32 %v169_v16, 15  ;;  %v134_v30 = vmul.u32 2146121005, %v130_v19  ;;  %v172_v39 = vshrl.u32 %v168_v27, 15  ;;  %v171_v8 = vmul.u32 2146121005, %v167_v51  ;;  %758 = vmatpush3.bf16.msra.mxu0 %v757_v47 }
  0x4d   :  { %v140_v14 = vxor.u32 %v136_v20, %v132_v11  ;;  %v202_v31 = vxor.u32 %v198_v21, %v194_v12  ;;  %v139_v28 = vxor.u32 %v135_v22, %v131_v13  ;;  %v201_v15 = vxor.u32 %v197_v29, %v193_v18  ;;  %760 = vmatprep.subr.bf16.mxu0 %v759_v54 }
  0x4e   :  { %v177_v37 = vxor.u32 %v173_v26, %v169_v16  ;;  %v138_v45 = vshrl.u32 %v134_v30, 15  ;;  %v176_v60 = vxor.u32 %v172_v39, %v168_v27  ;;  %v175_v16 = vshrl.u32 %v171_v8, 15 }
  0x4f   :  { %v144_v33 = vmul.u32 2221713035, %v140_v14  ;;  %v206_v46 = vmul.u32 2146121005, %v202_v31 }
  0x50   :  { %v181_v53 = vmul.u32 2221713035, %v177_v37  ;;  %v143_v59 = vmul.u32 2221713035, %v139_v28  ;;  %v142_v1 = vxor.u32 %v138_v45, %v134_v30  ;;  %762 = vmatpush3.bf16.msra.mxu0 %v761_v55  ;;  %v179_v57 = vxor.u32 %v175_v16, %v171_v8 }
  0x51   :  { %v148_v40 = vshrl.u32 %v144_v33, 16  ;;  %v210_v2 = vshrl.u32 %v206_v46, 15  ;;  %v205_v3 = vmul.u32 2146121005, %v201_v15  ;;  %v180_v41 = vmul.u32 2221713035, %v176_v60  ;;  %764 = vmatprep.subr.bf16.mxu0 %v763_v61 }
  0x52   :  { %v185_v35 = vshrl.u32 %v181_v53, 16  ;;  %v147_v36 = vshrl.u32 %v143_v59, 16  ;;  %v146_v11 = vmul.u32 2221713035, %v142_v1 }
  0x53   :  { %v152_v24 = vxor.u32 %v148_v40, %v144_v33  ;;  %v214_v12 = vxor.u32 %v210_v2, %v206_v46  ;;  %v209_v13 = vshrl.u32 %v205_v3, 15  ;;  %v184_v19 = vshrl.u32 %v180_v41, 16 }
  0x54   :  { %v189_v17 = vxor.u32 %v185_v35, %v181_v53  ;;  %v151_v18 = vxor.u32 %v147_v36, %v143_v59  ;;  %v150_v20 = vshrl.u32 %v146_v11, 16  ;;  %766 = vmatpush3.bf16.msra.mxu0 %v765_v4  ;;  %v183_v53 = vmul.u32 2221713035, %v179_v57 }
  0x55   :  { %v218_v21 = vmul.u32 2221713035, %v214_v12  ;;  %v230_v22 = vand.u32 65535, %v152_v24  ;;  %v238_v42 = vshrl.u32 %v152_v24, 16  ;;  %v213_v43 = vxor.u32 %v209_v13, %v205_v3  ;;  %768 = vmatprep.subr.bf16.mxu0 %v767_v5 }
  0x56   :  { %v246_v47 = vand.u32 65535, %v189_v17  ;;  %v254_v23 = vshrl.u32 %v189_v17, 16  ;;  %v188_v44 = vxor.u32 %v184_v19, %v180_v41  ;;  %v229_v48 = vand.u32 65535, %v151_v18 }
  0x57   :  { %v222_v54 = vshrl.u32 %v218_v21, 16  ;;  %v234_v26 = vcvt.s32.f32 %v230_v22  ;;  %v242_v27 = vcvt.s32.f32 %v238_v42  ;;  %v217_v29 = vmul.u32 2221713035, %v213_v43  ;;  %v433_v22 = vld [vmem:[#allocation9] sm:$0xff]  ;;  %v434_v42 = vld [vmem:[#allocation9 + $0x8] sm:$0xff] }
  0x58   :  { %v250_v30 = vcvt.s32.f32 %v246_v47  ;;  %v258_v14 = vcvt.s32.f32 %v254_v23  ;;  %v233_v31 = vcvt.s32.f32 %v229_v48  ;;  %v237_v28 = vshrl.u32 %v151_v18, 16  ;;  %770 = vmatpush3.bf16.msra.mxu0 %v769_v10 }
  0x59   :  { %v226_v34 = vxor.u32 %v222_v54, %v218_v21  ;;  %v262_v37 = vadd.f32 %v242_v27, %v234_v26  ;;  %v221_v49 = vshrl.u32 %v217_v29, 16  ;;  %v245_v50 = vand.u32 65535, %v188_v44  ;;  %v70_v54 = vld [vmem:[#allocation4] sm:$0xff] }
  0x5a   :  { %v241_v55 = vcvt.s32.f32 %v237_v28  ;;  %v253_v39 = vshrl.u32 %v188_v44, 16  ;;  %v154_v56 = vxor.u32 %v150_v20, %v146_v11  ;;  %v200_v59 = vshrl.u32 %v1128_v52, 16 }
  0x5b   :  { %v266_v61 = vadd.f32 %v262_v37, %v250_v30  ;;  %v282_v15 = vshrl.u32 %v226_v34, 9  ;;  %v225_v45 = vxor.u32 %v221_v49, %v217_v29  ;;  %v249_v33 = vcvt.s32.f32 %v245_v50  ;;  %v435_v29 = vld [vmem:[#allocation9 + $0x10] sm:$0xff]  ;;  %v436_v30 = vld [vmem:[#allocation9 + $0x18] sm:$0xff] }
  0x5c   :  { %v257_v46 = vcvt.s32.f32 %v253_v39  ;;  %v261_v51 = vadd.f32 %v241_v55, %v233_v31  ;;  %v232_v4 = vand.u32 65535, %v154_v56  ;;  %v187_v63 = vshrl.u32 %v183_v53, 16  ;;  %v437_v39 = vld [vmem:[#allocation9 + $0x20] sm:$0xff] }
  0x5d   :  { %v270_v60 = vadd.f32 %v266_v61, %v258_v14  ;;  %v286_v58 = vcvt.s32.f32 %v282_v15  ;;  %v281_v62 = vshrl.u32 %v225_v45, 9  ;;  %v204_v0 = vxor.u32 %v200_v59, %v1128_v52 }
  0x5e   :  { %v265_v1 = vadd.f32 %v261_v51, %v249_v33  ;;  %v240_v5 = vshrl.u32 %v154_v56, 16  ;;  %v236_v8 = vcvt.s32.f32 %v232_v4  ;;  %v191_v36 = vxor.u32 %v187_v63, %v183_v53  ;;  %v438_v56 = vld [vmem:[#allocation9 + $0x28] sm:$0xff]  ;;  %v439_v4 = vld [vmem:[#allocation9 + $0x30] sm:$0xff] }
  0x5f   :  { %v633_v40 = vadd.f32 -131070.0, %v270_v60  ;;  %v290_v2 = vmul.f32 1.1920929e-07, %v286_v58  ;;  %v285_v3 = vcvt.s32.f32 %v281_v62  ;;  %v208_v41 = vmul.u32 2146121005, %v204_v0 }
  0x60   :  { %v269_v35 = vadd.f32 %v265_v1, %v257_v46  ;;  %v244_v11 = vcvt.s32.f32 %v240_v5  ;;  %v248_v17 = vand.u32 65535, %v191_v36  ;;  %v256_v52 = vshrl.u32 %v191_v36, 16  ;;  %v440_v1 = vld [vmem:[#allocation9 + $0x38] sm:$0xff] }
  0x61   :  { %v278_v24 = vmul.f32 2.6428997e-05, %v633_v40  ;;  %v302_v12 = vmul.f32 0.00390625, %v290_v2  ;;  %v289_v13 = vmul.f32 1.1920929e-07, %v285_v3  ;;  %v212_v16 = vshrl.u32 %v208_v41, 15  ;;  %v73_v40 = vld [vmem:[#allocation4 + $0x18] sm:$0xff] }
  0x62   :  { %v632_v10 = vadd.f32 -131070.0, %v269_v35  ;;  %v264_v20 = vadd.f32 %v244_v11, %v236_v8  ;;  %v125_v21 = vshrl.u32 %v121_v6, 16  ;;  %v252_v23 = vcvt.s32.f32 %v248_v17 }
  0x63   :  { %v294_v18 = vmul.f32 0.003921569, %v278_v24  ;;  %v301_v19 = vmul.f32 0.00390625, %v289_v13  ;;  %v216_v47 = vxor.u32 %v212_v16, %v208_v41  ;;  %v260_v44 = vcvt.s32.f32 %v256_v52  ;;  %v441_v13 = vld [vmem:[#allocation9 + $0x40] sm:$0xff] }
  0x64   :  { %v277_v43 = vmul.f32 2.6428997e-05, %v632_v10  ;;  %v129_v26 = vxor.u32 %v125_v21, %v121_v6  ;;  %v195_v27 = vxor.u32 %v1113_v9, %v1037_v25  ;;  %v268_v28 = vadd.f32 %v264_v20, %v252_v23  ;;  %v442_v6 = vld [vmem:[#allocation9 + $0x48] sm:$0xff] }
  0x65   :  { %v298_v48 = vadd.f32 %v294_v18, %v71_v7  ;;  %v220_v31 = vmul.u32 2221713035, %v216_v47  ;;  %v771_v34 = vpack.c.bf16 %v434_v42, %v433_v22  ;;  %v162_v50 = vshrl.u32 %v158_v32, 16 }
  0x66   :  { %v293_v14 = vmul.f32 0.003921569, %v277_v43  ;;  %v133_v49 = vmul.u32 2146121005, %v129_v26  ;;  %v199_v55 = vshrl.u32 %v195_v27, 16  ;;  %v272_v15 = vadd.f32 %v268_v28, %v260_v44 }
  0x67   :  { %v306_v37 = vadd.f32 %v302_v12, %v298_v48  ;;  %v224_v61 = vshrl.u32 %v220_v31, 16  ;;  %772 = vmatprep.subr.bf16.mxu1 %v771_v34  ;;  %v775_v38 = vpack.c.bf16 %v436_v30, %v435_v29  ;;  %v166_v25 = vxor.u32 %v162_v50, %v158_v32 }
  0x68   :  { %v297_v57 = vadd.f32 %v293_v14, %v70_v54  ;;  %v137_v33 = vshrl.u32 %v133_v49, 15  ;;  %v203_v9 = vxor.u32 %v199_v55, %v195_v27  ;;  %774 = vmatpush3.bf16.msra.mxu1 %v771_v34  ;;  %v635_v53 = vadd.f32 -131070.0, %v272_v15  ;;  %v72_v55 = vld [vmem:[#allocation4 + $0x10] sm:$0xff] }
  0x69   :  { %v310_v45 = vmax.f32 %v306_v37, 0.0  ;;  %v228_v51 = vxor.u32 %v224_v61, %v220_v31  ;;  %776 = vmatprep.subr.bf16.mxu1 %v775_v38  ;;  %v779_v59 = vpack.c.bf16 %v438_v56, %v437_v39  ;;  %v170_v58 = vmul.u32 2146121005, %v166_v25  ;;  %v445_v25 = vld [vmem:[#allocation9 + $0x60] sm:$0xff] }
  0x6a   :  { %v305_v46 = vadd.f32 %v301_v19, %v297_v57  ;;  %v141_v60 = vxor.u32 %v137_v33, %v133_v49  ;;  %v207_v62 = vmul.u32 2146121005, %v203_v9  ;;  %v280_v0 = vmul.f32 2.6428997e-05, %v635_v53  ;;  %v446_v9 = vld [vmem:[#allocation9 + $0x68] sm:$0xff]  ;;  %v448_v53 = vld [vmem:[#allocation9 + $0x78] sm:$0xff] }
  0x6b   :  { %416 = vmatprep.mubr.f32.mxu0 %v310_v45  ;;  %v284_v5 = vshrl.u32 %v228_v51, 9  ;;  %v174_v3 = vshrl.u32 %v170_v58, 15  ;;  %v783_v41 = vpack.c.bf16 %v440_v1, %v439_v4  ;;  %v787_v19 = vpack.c.bf16 %v442_v6, %v441_v13  ;;  %v444_v45 = vld [vmem:[#allocation9 + $0x58] sm:$0xff]  ;;  %v447_v51 = vld [vmem:[#allocation9 + $0x70] sm:$0xff] }
  0x6c   :  { %v309_v63 = vmax.f32 %v305_v46, 0.0  ;;  %v145_v2 = vmul.u32 2221713035, %v141_v60  ;;  %v211_v8 = vshrl.u32 %v207_v62, 15  ;;  %778 = vmatpush3.bf16.msra.mxu1 %v775_v38  ;;  %v296_v36 = vmul.f32 0.003921569, %v280_v0 }
  0x6d   :  { %v288_v35 = vcvt.s32.f32 %v284_v5  ;;  %780 = vmatprep.subr.bf16.mxu1 %v779_v59  ;;  %v178_v24 = vxor.u32 %v174_v3, %v170_v58  ;;  %v443_v38 = vld [vmem:[#allocation9 + $0x50] sm:$0xff]  ;;  %v795_v46 = vpack.c.bf16 %v446_v9, %v445_v25  ;;  %v636_v58 = vld [vmem:[%s1186_s3] ss:$0 sm:$0xff] }
  0x6e   :  { %417 = vmatmul.mubr.f32.vlgmr.msra.gmra.mrb[0].mxu0 %v309_v63  ;;  %v149_v11 = vshrl.u32 %v145_v2, 16  ;;  %v215_v12 = vxor.u32 %v211_v8, %v207_v62  ;;  %v300_v10 = vadd.f32 %v296_v36, %v73_v40  ;;  %v791_v33 = vpack.c.bf16 %v444_v45, %v443_v38 }
  0x6f   :  { %v292_v7 = vmul.f32 1.1920929e-07, %v288_v35  ;;  %v182_v17 = vmul.u32 2221713035, %v178_v24  ;;  %v920_v36 = vmov 0.0|0.0   ;;  %v923_v24 = vmov 0  }
  0x70   :  { %v153_v16 = vxor.u32 %v149_v11, %v145_v2  ;;  %v219_v52 = vmul.u32 2221713035, %v215_v12  ;;  %782 = vmatpush3.bf16.msra.mxu1 %v779_v59  ;;  %v799_v59 = vpack.c.bf16 %v448_v53, %v447_v51  ;;  %803 = vmatprep.subr.bf16.mxu0 %v920_v36  ;;  %v538_v11 = vld [vmem:[%s1190_s7] sm:$0xff] }
  0x71   :  { %v304_v18 = vmul.f32 0.00390625, %v292_v7  ;;  %784 = vmatprep.subr.bf16.mxu1 %v783_v41  ;;  %v186_v20 = vshrl.u32 %v182_v17, 16  ;;  %818 = vset.pattern.permute.xlu0 %v923_v24  ;;  %v637_v12 = vld [vmem:[%s1188_s5] ss:$0 sm:$0xff]  ;;  %s622_s5 = sshll.u32 %s924_s10, 4  ;;  %s623_s5 = int_to_ptr.vmem [resolvable:$true] %s622_s5 }
  0x72   :  { %v223_v21 = vshrl.u32 %v219_v52, 16  ;;  %v231_v22 = vand.u32 65535, %v153_v16  ;;  %v239_v42 = vshrl.u32 %v153_v16, 16  ;;  %541 = vperm.xlu0 %818, %v538_v11   ;;  %s885_s11 = scalar_lea.vmem %s623_s5, 128  ;;  %p890_p11 = scmp.lt.s32.totalorder %s623_s5, %s623_s5 }
  0x73   :  { %v308_v43 = vadd.f32 %v304_v18, %v300_v10  ;;  %v190_v47 = vxor.u32 %v186_v20, %v182_v17  ;;  %v537_v20 = vld [vmem:[%s1189_s6] sm:$0xff]  ;;  %p886_p10 = scmp.ne.s32.totalorder %s623_s5, %s885_s11  ;;  %p891_p12 = scmp.lt.s32.totalorder %s885_s11, %s885_s11 }
  0x74   :  { %v227_v23 = vxor.u32 %v223_v21, %v219_v52  ;;  %v235_v44 = vcvt.s32.f32 %v231_v22  ;;  %v243_v48 = vcvt.s32.f32 %v239_v42  ;;  %786 = vmatpush3.bf16.msra.mxu1 %v783_v41  ;;  %v922_v41 = vmov 0.0  }
  0x75   :  { %v312_v54 = vmax.f32 %v308_v43, 0.0  ;;  %788 = vmatprep.subr.bf16.mxu1 %v787_v19  ;;  %v247_v26 = vand.u32 65535, %v190_v47  ;;  %v255_v32 = vshrl.u32 %v190_v47, 16  ;;  %p892_p13 = por %p891_p12, %p890_p11 }
  0x76   :  { %v263_v27 = vadd.f32 %v243_v48, %v235_v44  ;;  %v283_v29 = vshrl.u32 %v227_v23, 9 }
  0x77   :  { %421 = vmatprep.mubr.f32.mxu0 %v312_v54  ;;  %v251_v30 = vcvt.s32.f32 %v247_v26  ;;  %v259_v14 = vcvt.s32.f32 %v255_v32  ;;  %p893_p0 = pnand %p892_p13, %p886_p10 }
  0x78   :  { %790 = vmatpush3.bf16.msra.mxu1 %v787_v19  ;;  %v287_v28 = vcvt.s32.f32 %v283_v29 }
  0x79   :  { %v267_v31 = vadd.f32 %v263_v27, %v251_v30  ;;  %792 = vmatprep.subr.bf16.mxu1 %v791_v33 }
  0x7a   :  { %v291_v49 = vmul.f32 1.1920929e-07, %v287_v28 }
  0x7b   :  { %v271_v34 = vadd.f32 %v267_v31, %v259_v14 }
  0x7c   :  { %v303_v56 = vmul.f32 0.00390625, %v291_v49  ;;  %794 = vmatpush3.bf16.msra.mxu1 %v791_v33 }
  0x7d   :  { %v634_v37 = vadd.f32 -131070.0, %v271_v34  ;;  %796 = vmatprep.subr.bf16.mxu1 %v795_v46 }
  0x7f   :  { %v279_v50 = vmul.f32 2.6428997e-05, %v634_v37 }
  0x80   :  { %798 = vmatpush3.bf16.msra.mxu1 %v795_v46 }
  0x81   :  { %v295_v39 = vmul.f32 0.003921569, %v279_v50  ;;  %800 = vmatprep.subr.bf16.mxu1 %v799_v59 }
  0x83   :  { %v299_v57 = vadd.f32 %v295_v39, %v72_v55 }
  0x84   :  { %802 = vmatpush3.bf16.msra.mxu1 %v799_v59 }
  0x85   :  { %v307_v61 = vadd.f32 %v303_v56, %v299_v57 }
  0x87   :  { %v311_v15 = vmax.f32 %v307_v61, 0.0 }
  0x89   :  { %422 = vmatmul.mubr.f32.gmra.mrb[2].mxu0 %v311_v15 }
  0x8a   :  { %736 = vmatprep.mubr.msk.f32.mxu0 %vm921_vm2, %v922_v41 }
  0xf1   :  { %v542_v21 = vpop.permute.xlu0 %541 }
 0x141   :  { %v670_v60 = vpop.f32.mrb[0].mxu0 }
 0x142   :  { %v671_v62 = vpop.f32.mrb[1].mxu0 }
 0x143   :  { %v672_v4 = vadd.f32 %v671_v62, %v670_v60 }
 0x145   :  { %v419_v1 = vadd.f32 %v672_v4, %v636_v58 }
 0x147   :  { %vm427_vm0 = vcmp.gt.f32.partialorder %v419_v1, 0.0  ;;  %v429_v63 = vmul.f32 0.1, %v419_v1 }
 0x149   :  { %v431_v0 = vsel %vm427_vm0, %v419_v1, %v429_v63 }
 0x14a   :  { %729 = vmatprep.mubr.f32.mxu1 %v431_v0 }
 0x15c   :  { %v673_v5 = vpop.f32.mrb[2].mxu0 }
 0x15d   :  { %v674_v40 = vpop.f32.mrb[3].mxu0 }
 0x15e   :  { %v675_v2 = vadd.f32 %v674_v40, %v673_v5 }
 0x160   :  { %v424_v3 = vadd.f32 %v675_v2, %v636_v58 }
 0x162   :  { %vm428_vm1 = vcmp.gt.f32.partialorder %v424_v3, 0.0  ;;  %v430_v8 = vmul.f32 0.1, %v424_v3 }
 0x164   :  { %v432_v35 = vsel %vm428_vm1, %v424_v3, %v430_v8 }
 0x165   :  { %730 = vmatmul.mubr.f32.vlgmr.msra.gmra.mrb[0].mxu1 %v432_v35 }
 0x238   :  { %v731_v13 = vpop.f32.mrb[0].mxu1 }
 0x239   :  { %v528_v6 = vadd.f32 %v731_v13, %v637_v12  ;;  %v522_v7 = vpop.f32.mrb[1].mxu1 }
 0x23a   :  { %v523_v10 = vadd.f32 %v637_v12, %v522_v7 }
 0x23b   :  { %vm532_vm3 = vcmp.gt.f32.partialorder %v528_v6, 0.0  ;;  %v534_v16 = vmul.f32 0.1, %v528_v6 }
 0x23c   :  { %vm531_vm4 = vcmp.gt.f32.partialorder %v523_v10, 0.0  ;;  %v533_v17 = vmul.f32 0.1, %v523_v10 }
 0x23d   :  { %v536_v52 = vsel %vm532_vm3, %v528_v6, %v534_v16 }
 0x23e   :  { %v535_v18 = vsel %vm531_vm4, %v523_v10, %v533_v17 }
 0x23f   :  { %v804_v19 = vpack.c.bf16 %v536_v52, %v535_v18 }
 0x241   :  { %805 = vmatpush3.bf16.xpose.msra.mxu0 %v804_v19 }
 0x248   :  { %737 = vmatmul.mubr.f32.vlgmr.msra.gmra.mrb[4].mxu0 %v537_v20 }
 0x31b   :  { %v610_v22 = vpop.f32.mrb[4].mxu0 }
 0x31c   :  { %v611_v42 = vadd.f32 %v610_v22, %v542_v21  ;;  %v738_v43 = vpop.f32.mrb[5].mxu0 }
 0x31e   :  { %615 = vst.msk [vmem:[#allocation10] sm:$0xff] %vm614_vm5, %v611_v42 }
 0x31f   :  { %896 = shalt.err (!%p893_p0)
}
 0x320   :  { %s897_s6 = scalar_lea.hbm %s1191_s8, 128 }
 0x321   :  { %p898_p1 = scmp.ne.s32.totalorder %s1191_s8, %s897_s6  ;;  %p901_p2 = scmp.lt.u32.totalorder %s897_s6, %s1191_s8 }
 0x323   :  { %p903_p3 = pnand %p901_p2, %p898_p1 }
 0x325   :  { %906 = shalt.err (!%p903_p3)
}
 0x326   :  { %625 = dma.vmem_to_hbm [thread:$0]  %s623_s5, 128, %s1191_s8, [#allocation6]  }
 0x327   :  { %911 = dma.done.wait [#allocation6], 128  }
 0x328   :  { %912 = vsyncadd [#allocation6], 4294967168 }
 0x329   :  { %629 = vsyncpa [#allocation5], 1 }
 0x32a   :  { %630 = vsyncpa [#allocation8], 1 }
 0x32b   :  { %631 = vsyncpa [#allocation6], 1 }

</bundles_post_ra>
